<compile_context>
chip_gen: v5e
topology: v5e:2x2
jax: 0.10.0
libtpu: 0.0.40
codegen_flags: <defaults>
</compile_context>

<pallas_src>
import functools

import jax
import jax.numpy as jnp
from jax import lax
from jax.experimental import pallas as pl
from jax.experimental.pallas import tpu as pltpu


def _round_up(x, m):
    return (x + m - 1) // m * m


# --------------------------------------------------------------------------- #
# Kernel 1: fc_input (+ReLU), GATConv linear projection, and the per-head
#           attention-score projections (a_src | a_dst), tiled over rows.
# --------------------------------------------------------------------------- #
def _project_kernel(x_ref, w_in_ref, b_in_ref, w_gat_ref, att_bd_ref, z_ref, a_ref):
    h = jnp.dot(x_ref[...], w_in_ref[...],
                preferred_element_type=jnp.float32) + b_in_ref[...]
    h = jnp.maximum(h, 0.0)                                    # ReLU (f32 VPU)
    z = jnp.dot(h.astype(jnp.bfloat16), w_gat_ref[...],
                preferred_element_type=jnp.float32)            # [TILE, H*C] f32
    z_ref[...] = z.astype(z_ref.dtype)                         # bf16 to HBM
    # Block-diagonal score projections: lanes [0:H]=a_src, [H:2H]=a_dst, rest zero-pad.
    a_ref[...] = jnp.dot(z.astype(jnp.bfloat16), att_bd_ref[...],
                         preferred_element_type=jnp.float32)   # [TILE, A_PAD] f32


# --------------------------------------------------------------------------- #
# Kernel 2: multi-head GAT attention over a dst-row tile + fused mean|var head.
# --------------------------------------------------------------------------- #
def _attention_kernel(n_heads, n_channels, n_out, n_src, bf16_softmax,
                      a_slab_ref, a_src_t_ref, z_src_ref, e_ref,
                      gat_bias_ref, w_out_ref, b_out_ref, y_ref):
    H, C, Ns = n_heads, n_channels, n_src

    z_src = z_src_ref[...]                                     # [Ns, H*C] bf16
    head_outs = []
    for hh in range(H):                                        # static unroll over heads
        # e already contains mask (-1e30) + self-loop + edge contributions.
        e = e_ref[:, hh * Ns:(hh + 1) * Ns].astype(jnp.float32)     # [TILE, Ns]
        a_dst = a_slab_ref[:, H + hh:H + hh + 1]                    # [TILE, 1]
        a_src = a_src_t_ref[hh:hh + 1, :]                           # [1, Ns]
        logits = a_dst + a_src + e
        logits = jnp.where(logits > 0, logits, 0.2 * logits)        # LeakyReLU(0.2)
        row_max = jnp.max(logits, axis=1, keepdims=True)
        shifted = logits - row_max
        if bf16_softmax:                                            # v6e / v7x: bf16 EUP/VPU
            p = jnp.exp(shifted.astype(jnp.bfloat16))
            denom = jnp.sum(p.astype(jnp.float32), axis=1, keepdims=True)
            inv = pl.reciprocal(jnp.maximum(denom, 1e-16), approx=True)
            alpha = p * inv.astype(jnp.bfloat16)                    # bf16 for MXU
        else:                                                       # v5e: f32 VPU/EUP only
            p = jnp.exp(shifted)
            denom = jnp.sum(p, axis=1, keepdims=True)
            inv = pl.reciprocal(jnp.maximum(denom, 1e-16), approx=True)
            alpha = (p * inv).astype(jnp.bfloat16)
        head_outs.append(jnp.dot(alpha, z_src[:, hh * C:(hh + 1) * C],
                                 preferred_element_type=jnp.float32))

    # One lane-dense [TILE, H*C] slab instead of H masked 32-lane scratch stores.
    out = jnp.concatenate(head_outs, axis=-1) + gat_bias_ref[...]

    # Fused fc_mean | fc_var head -> single lane-dense [TILE, OUT_PAD] matmul.
    y = jnp.dot(out.astype(jnp.bfloat16), w_out_ref[...],
                preferred_element_type=jnp.float32) + b_out_ref[...]
    col = lax.broadcasted_iota(jnp.int32, y.shape, 1)
    y_ref[...] = jnp.where((col >= n_out) & (col < 2 * n_out), jnp.exp(y), y)


# --------------------------------------------------------------------------- #
# Parameters & wrapper
# --------------------------------------------------------------------------- #
def make_params(key, n_input, n_output, n_hidden, gat_hidden_dim, n_heads, n_edges):
    H, C = n_heads, n_hidden          # single GAT layer: out_channels = n_hidden
    keys = jax.random.split(key, 14)

    def rnd(k, shape, scale=0.1):
        return jax.random.normal(k, shape, dtype=jnp.float32) * scale

    return dict(
        w_in=rnd(keys[0], (n_input, gat_hidden_dim)),
        b_in=rnd(keys[1], (1, gat_hidden_dim)),
        w_gat=rnd(keys[2], (gat_hidden_dim, H * C)),
        att_src=rnd(keys[3], (H, C)),
        att_dst=rnd(keys[4], (H, C)),
        att_edge=rnd(keys[5], (H, C)),
        w_edge=rnd(keys[6], (H, C)),          # lin_edge weight (per-head view)
        gat_bias=rnd(keys[7], (1, H * C)),
        w_mean=rnd(keys[8], (H * C, n_output)),
        b_mean=rnd(keys[9], (1, n_output)),
        w_var=rnd(keys[10], (H * C, n_output)),
        b_var=rnd(keys[11], (1, n_output)),
        edge_weights=jnp.abs(rnd(keys[12], (n_edges,), scale=1.0)),   # homology_scores
        attention_weight=jnp.ones((n_edges, H), dtype=jnp.float32),   # torch.ones(E, n_heads)
    )


def sparse_gat_encoder_forward(x, params, edge_index, gumbel_key, temperature=0.5):
    N, n_input = x.shape
    H, C = params["att_src"].shape
    HC = H * C
    Dh = params["w_in"].shape[1]
    n_output = params["w_mean"].shape[1]
    src, dst = edge_index[0], edge_index[1]     # PyG convention: row0 = source

    # ---- host-side glue: gumbel-softmax (hard) + edge attention contributions ----
    logits = params["attention_weight"]
    g = jax.random.gumbel(gumbel_key, logits.shape, dtype=logits.dtype)
    y_soft = jax.nn.softmax((logits + g) / temperature, axis=-1)
    sparse_attention = jax.nn.one_hot(jnp.argmax(y_soft, axis=-1), H, dtype=logits.dtype)
    ew = params["edge_weights"][:, None] * sparse_attention               # [E, H]

    # TODO(synk): the PyTorch module feeds [E, n_heads] edge features into a GATConv
    # built with edge_dim=1 (shape mismatch); here lin_edge is applied per-head to
    # the scalar edge weight of that head.
    A = jnp.sum(params["w_edge"] * params["att_edge"], axis=-1)           # [H]
    alpha_edge = ew * A[None, :]                                          # [E, H]

    # GATConv defaults: add_self_loops=True with fill_value='mean'.
    fill = jnp.mean(ew, axis=0)                                           # [H]
    alpha_self = fill * A                                                 # [H]

    # ---- padding / tiling ----
    TILE = min(128, _round_up(N, 8))
    if _round_up(N, TILE) // TILE < 2 and TILE > 8:
        TILE = _round_up(TILE // 2, 8)      # expose >=2 row tiles for v7x megacore
    N_pad = _round_up(N, TILE)
    n_tiles = N_pad // TILE
    OUT_PAD = max(128, _round_up(2 * n_output, 128))
    A_PAD = max(128, _round_up(2 * H, 128))

    x_pad = jnp.zeros((N_pad, n_input), jnp.bfloat16).at[:N].set(x.astype(jnp.bfloat16))

    # e_alpha with the adjacency mask folded in (-1e30 fill), self loops included,
    # laid out [N_pad(dst), H*N_pad(src)] so each dst tile is one contiguous bf16 DMA.
    NEG = jnp.float32(-1e30)
    e_alpha = jnp.full((H, N_pad, N_pad), NEG, jnp.float32)
    e_alpha = e_alpha.at[:, dst, src].set(alpha_edge.T)
    diag = jnp.arange(N)
    e_alpha = e_alpha.at[:, diag, diag].set(alpha_self[:, None])
    e_alpha = jnp.transpose(e_alpha, (1, 0, 2)).reshape(N_pad, H * N_pad)
    e_alpha = e_alpha.astype(jnp.bfloat16)

    # Block-diagonal [H*C, A_PAD] score-projection matrix: cols [0:H]=att_src, [H:2H]=att_dst.
    att_bd = jnp.zeros((HC, A_PAD), jnp.float32)
    for hh in range(H):
        att_bd = att_bd.at[hh * C:(hh + 1) * C, hh].set(params["att_src"][hh])
        att_bd = att_bd.at[hh * C:(hh + 1) * C, H + hh].set(params["att_dst"][hh])
    att_bd = att_bd.astype(jnp.bfloat16)

    # Fused, lane-dense output head:  [H*C, OUT_PAD] = [mean | var | zero-pad]  (bf16).
    w_out = jnp.zeros((HC, OUT_PAD), jnp.float32)
    w_out = w_out.at[:, :n_output].set(params["w_mean"])
    w_out = w_out.at[:, n_output:2 * n_output].set(params["w_var"])
    w_out = w_out.astype(jnp.bfloat16)
    b_out = jnp.zeros((1, OUT_PAD), jnp.float32)
    b_out = b_out.at[:, :n_output].set(params["b_mean"])
    b_out = b_out.at[:, n_output:2 * n_output].set(params["b_var"])

    w_in_bf = params["w_in"].astype(jnp.bfloat16)
    w_gat_bf = params["w_gat"].astype(jnp.bfloat16)

    # bf16 softmax only on chips with bf16 VPU/EUP (v6e / v7x); f32 on v5e and older.
    try:
        kind = jax.devices()[0].device_kind.lower()
    except Exception:
        kind = ""
    bf16_softmax = ("v6" in kind) or ("v7" in kind)

    parallel = pltpu.CompilerParams(dimension_semantics=("parallel",))

    # ---- kernel 1: projection + attention-score projections, tiled over rows ----
    z, a_slab = pl.pallas_call(
        _project_kernel,
        out_shape=(jax.ShapeDtypeStruct((N_pad, HC), jnp.bfloat16),
                   jax.ShapeDtypeStruct((N_pad, A_PAD), jnp.float32)),
        grid=(n_tiles,),
        in_specs=[
            pl.BlockSpec((TILE, n_input), lambda i: (i, 0)),
            pl.BlockSpec((n_input, Dh), lambda i: (0, 0)),
            pl.BlockSpec((1, Dh), lambda i: (0, 0)),
            pl.BlockSpec((Dh, HC), lambda i: (0, 0)),
            pl.BlockSpec((HC, A_PAD), lambda i: (0, 0)),
        ],
        out_specs=[pl.BlockSpec((TILE, HC), lambda i: (i, 0)),
                   pl.BlockSpec((TILE, A_PAD), lambda i: (i, 0))],
        compiler_params=parallel,
    )(x_pad, w_in_bf, params["b_in"], w_gat_bf, att_bd)

    # a_src transposed once in XLA (tiny) -> [H, N_pad]; a_dst stays inside a_slab.
    a_src_t = jnp.transpose(a_slab[:, :H])

    # ---- kernel 2 VMEM budget (double-buffered blocks + unrolled f32 temporaries) ----
    blk_bytes = (TILE * A_PAD * 4 + H * N_pad * 4 + N_pad * HC * 2
                 + TILE * H * N_pad * 2 + HC * 4 + HC * OUT_PAD * 2
                 + OUT_PAD * 4 + TILE * OUT_PAD * 4)
    temp_bytes = 3 * H * TILE * N_pad * 4
    vmem_limit = int(min(max(2 * blk_bytes + temp_bytes + (4 << 20), 16 << 20), 128 << 20))
    attn_params = pltpu.CompilerParams(dimension_semantics=("parallel",),
                                       vmem_limit_bytes=vmem_limit)

    # ---- kernel 2: attention + fused output head, tiled over dst rows ----
    y = pl.pallas_call(
        functools.partial(_attention_kernel, H, C, n_output, N_pad, bf16_softmax),
        out_shape=jax.ShapeDtypeStruct((N_pad, OUT_PAD), jnp.float32),
        grid=(n_tiles,),
        in_specs=[
            pl.BlockSpec((TILE, A_PAD), lambda i: (i, 0)),        # a_src|a_dst slab (dst tile)
            pl.BlockSpec((H, N_pad), lambda i: (0, 0)),           # a_src_t (all sources)
            pl.BlockSpec((N_pad, HC), lambda i: (0, 0)),          # z (all sources, bf16)
            pl.BlockSpec((TILE, H * N_pad), lambda i: (i, 0)),    # e_alpha tile (bf16, mask folded)
            pl.BlockSpec((1, HC), lambda i: (0, 0)),              # gat bias
            pl.BlockSpec((HC, OUT_PAD), lambda i: (0, 0)),        # fused mean|var weight (bf16)
            pl.BlockSpec((1, OUT_PAD), lambda i: (0, 0)),         # fused mean|var bias
        ],
        out_specs=pl.BlockSpec((TILE, OUT_PAD), lambda i: (i, 0)),
        compiler_params=attn_params,
    )(a_slab, a_src_t, z, e_alpha, params["gat_bias"], w_out, b_out)

    mean = y[:N, :n_output]
    var = y[:N, n_output:2 * n_output]
    return mean, var


if __name__ == "__main__":
    key = jax.random.PRNGKey(0)
    N, n_input, n_output = 8, 16, 8
    gat_hidden_dim, n_heads, n_hidden = 32, 4, 32

    # deterministic homology edge list (src row, dst row), no self loops, no dups
    src = jnp.array([0, 1, 2, 3, 4, 5, 6, 7, 0, 2, 4, 6], jnp.int32)
    dst = jnp.array([1, 2, 3, 4, 5, 6, 7, 0, 3, 5, 7, 1], jnp.int32)
    edge_index = jnp.stack([src, dst])
    n_edges = int(src.shape[0])

    pkey, xkey, gkey = jax.random.split(key, 3)
    params = make_params(pkey, n_input, n_output, n_hidden, gat_hidden_dim,
                         n_heads, n_edges)
    x = jax.random.normal(xkey, (N, n_input), dtype=jnp.float32)

    mean, var = sparse_gat_encoder_forward(x, params, edge_index, gkey,
                                           temperature=0.5)
    jax.block_until_ready((mean, var))
    assert mean.shape == (N, n_output) and var.shape == (N, n_output)
    assert bool(jnp.all(jnp.isfinite(mean))) and bool(jnp.all(var > 0))
    print("KERNEL_OK")
</pallas_src>

<mosaic_0001>
module attributes {stable_mosaic.version = 11 : i64} {
  func.func @_project_kernel(%arg0: i32, %arg1: memref<8x16xbf16, #tpu.memory_space<vmem>>, %arg2: memref<16x32xbf16, #tpu.memory_space<vmem>>, %arg3: memref<1x32xf32, #tpu.memory_space<vmem>>, %arg4: memref<32x128xbf16, #tpu.memory_space<vmem>>, %arg5: memref<128x128xbf16, #tpu.memory_space<vmem>>, %arg6: memref<8x128xbf16, #tpu.memory_space<vmem>>, %arg7: memref<8x128xf32, #tpu.memory_space<vmem>>) attributes {dimension_semantics = [#tpu.dimension_semantics<parallel>], iteration_bounds = array<i64: 1>, scalar_prefetch = 0 : i64, scratch_operands = 0 : i64, tpu.core_type = #tpu.core_type<tc>, window_params = [{transform_indices = @transform_0, window_bounds = array<i64: 8, 16>}, {pipeline_mode = #tpu.pipeline_mode<synchronous>, transform_indices = @transform_1, window_bounds = array<i64: 16, 32>}, {pipeline_mode = #tpu.pipeline_mode<synchronous>, transform_indices = @transform_2, window_bounds = array<i64: 1, 32>}, {pipeline_mode = #tpu.pipeline_mode<synchronous>, transform_indices = @transform_3, window_bounds = array<i64: 32, 128>}, {pipeline_mode = #tpu.pipeline_mode<synchronous>, transform_indices = @transform_4, window_bounds = array<i64: 128, 128>}, {transform_indices = @transform_5, window_bounds = array<i64: 8, 128>}, {transform_indices = @transform_6, window_bounds = array<i64: 8, 128>}]} {
    %c0 = arith.constant 0 : index
    %c0_0 = arith.constant 0 : index
    %0 = vector.load %arg1[%c0, %c0_0] : memref<8x16xbf16, #tpu.memory_space<vmem>>, vector<8x16xbf16>
    %c0_1 = arith.constant 0 : index
    %c0_2 = arith.constant 0 : index
    %1 = vector.load %arg2[%c0_1, %c0_2] : memref<16x32xbf16, #tpu.memory_space<vmem>>, vector<16x32xbf16>
    %cst = arith.constant dense<0.000000e+00> : vector<8x32xf32>
    %2 = tpu.matmul %0, %1, %cst {dimension_numbers = #tpu.dot_dimension_numbers<[1], [0], [0], [1], [0, 0, 1, 1], [], []>} : vector<8x16xbf16>, vector<16x32xbf16>, vector<8x32xf32> -> vector<8x32xf32>
    %c0_3 = arith.constant 0 : index
    %c0_4 = arith.constant 0 : index
    %3 = vector.load %arg3[%c0_3, %c0_4] : memref<1x32xf32, #tpu.memory_space<vmem>>, vector<1x32xf32>
    %4 = vector.broadcast %3 : vector<1x32xf32> to vector<8x32xf32>
    %5 = arith.addf %2, %4 : vector<8x32xf32>
    %cst_5 = arith.constant 0.000000e+00 : f32
    %6 = vector.broadcast %cst_5 : f32 to vector<8x32xf32>
    %7 = arith.maximumf %5, %6 : vector<8x32xf32>
    %8 = arith.truncf %7 : vector<8x32xf32> to vector<8x32xbf16>
    %c0_6 = arith.constant 0 : index
    %c0_7 = arith.constant 0 : index
    %9 = vector.load %arg4[%c0_6, %c0_7] : memref<32x128xbf16, #tpu.memory_space<vmem>>, vector<32x128xbf16>
    %cst_8 = arith.constant dense<0.000000e+00> : vector<8x128xf32>
    %10 = tpu.matmul %8, %9, %cst_8 {dimension_numbers = #tpu.dot_dimension_numbers<[1], [0], [0], [1], [0, 0, 1, 1], [], []>} : vector<8x32xbf16>, vector<32x128xbf16>, vector<8x128xf32> -> vector<8x128xf32>
    %11 = arith.truncf %10 : vector<8x128xf32> to vector<8x128xbf16>
    %c0_9 = arith.constant 0 : index
    %c0_10 = arith.constant 0 : index
    %12 = vector.load %arg6[%c0_9, %c0_10] : memref<8x128xbf16, #tpu.memory_space<vmem>>, vector<8x128xbf16>
    tpu.vector_store %arg6[%c0_9, %c0_10], %11 {strides = array<i32>} : memref<8x128xbf16, #tpu.memory_space<vmem>>, vector<8x128xbf16>,
    %13 = arith.truncf %10 : vector<8x128xf32> to vector<8x128xbf16>
    %c0_11 = arith.constant 0 : index
    %c0_12 = arith.constant 0 : index
    %14 = vector.load %arg5[%c0_11, %c0_12] : memref<128x128xbf16, #tpu.memory_space<vmem>>, vector<128x128xbf16>
    %cst_13 = arith.constant dense<0.000000e+00> : vector<8x128xf32>
    %15 = tpu.matmul %13, %14, %cst_13 {dimension_numbers = #tpu.dot_dimension_numbers<[1], [0], [0], [1], [0, 0, 1, 1], [], []>} : vector<8x128xbf16>, vector<128x128xbf16>, vector<8x128xf32> -> vector<8x128xf32>
    %c0_14 = arith.constant 0 : index
    %c0_15 = arith.constant 0 : index
    %16 = vector.load %arg7[%c0_14, %c0_15] : memref<8x128xf32, #tpu.memory_space<vmem>>, vector<8x128xf32>
    tpu.vector_store %arg7[%c0_14, %c0_15], %15 {strides = array<i32>} : memref<8x128xf32, #tpu.memory_space<vmem>>, vector<8x128xf32>,
    return
  }
  func.func @transform_0(%arg0: i32) -> (i32, i32) {
    %c0_i32 = arith.constant 0 : i32
    %c0_i32_0 = arith.constant 0 : i32
    return %arg0, %c0_i32 : i32, i32
  }
  func.func @transform_1(%arg0: i32) -> (i32, i32) {
    %c0_i32 = arith.constant 0 : i32
    %c0_i32_0 = arith.constant 0 : i32
    %c0_i32_1 = arith.constant 0 : i32
    return %c0_i32, %c0_i32_0 : i32, i32
  }
  func.func @transform_2(%arg0: i32) -> (i32, i32) {
    %c0_i32 = arith.constant 0 : i32
    %c0_i32_0 = arith.constant 0 : i32
    %c0_i32_1 = arith.constant 0 : i32
    return %c0_i32, %c0_i32_0 : i32, i32
  }
  func.func @transform_3(%arg0: i32) -> (i32, i32) {
    %c0_i32 = arith.constant 0 : i32
    %c0_i32_0 = arith.constant 0 : i32
    %c0_i32_1 = arith.constant 0 : i32
    return %c0_i32, %c0_i32_0 : i32, i32
  }
  func.func @transform_4(%arg0: i32) -> (i32, i32) {
    %c0_i32 = arith.constant 0 : i32
    %c0_i32_0 = arith.constant 0 : i32
    %c0_i32_1 = arith.constant 0 : i32
    return %c0_i32, %c0_i32_0 : i32, i32
  }
  func.func @transform_5(%arg0: i32) -> (i32, i32) {
    %c0_i32 = arith.constant 0 : i32
    %c0_i32_0 = arith.constant 0 : i32
    return %arg0, %c0_i32 : i32, i32
  }
  func.func @transform_6(%arg0: i32) -> (i32, i32) {
    %c0_i32 = arith.constant 0 : i32
    %c0_i32_0 = arith.constant 0 : i32
    return %arg0, %c0_i32 : i32, i32
  }
}

</mosaic_0001>

<bundles_post_ra>
// kernel: tpu_custom_call.1
= control target key start
LH: loop header
LB: loop body
LE: loop exit
PB: predicated region body
PF: predicated region fallthrough
CT: control target
= control target key end

     0   :  { %12 = vsyncpa [#allocation3], 0  ;;  %s550_s0 = inlined_call_operand.hbm [shape: bf16[8,16], index: 0, kind: input, shape index: {}]   ;;  %s551_s1 = inlined_call_operand.hbm [shape: bf16[16,32], index: 1, kind: input, shape index: {}]   ;;  %s552_s2 = inlined_call_operand.vmem [shape: f32[1,32], index: 2, kind: input, shape index: {}]   ;;  %s553_s3 = inlined_call_operand.hbm [shape: bf16[32,128], index: 3, kind: input, shape index: {}]   ;;  %s554_s4 = inlined_call_operand.hbm [shape: bf16[128,128], index: 4, kind: input, shape index: {}]   ;;  %s555_s5 = inlined_call_operand.hbm [shape: bf16[8,128], index: 5, kind: output, shape index: {0}]   ;;  %s556_s6 = inlined_call_operand.hbm [shape: f32[8,128], index: 6, kind: output, shape index: {1}]  }
   0x1   :  { %13 = vsyncpa [#allocation6], 0 }
   0x2   :  { %14 = vsyncpa [#allocation9], 0 }
   0x3   :  { %15 = vsyncpa [#allocation4], 0  ;;  %s32_s23 = sshll.u32 %s551_s1, 4  ;;  %s33_s23 = int_to_ptr.hbm [resolvable:$true] %s32_s23 }
   0x4   :  { %16 = vsyncpa [#allocation12], 0  ;;  %s486_s24 = smov [#allocation5]   ;;  %s22_s28 = sshll.u32 %s550_s0, 4  ;;  %s23_s28 = int_to_ptr.hbm [resolvable:$true] %s22_s28 }
   0x5   :  { %s34_s25 = sshll.u32 %s486_s24, 4  ;;  %s487_s29 = smov 64   ;;  %s35_s25 = int_to_ptr.vmem [resolvable:$true] %s34_s25 }
   0x6   :  { %s488_s30 = smov 4   ;;  %s489_s7 = smov [#allocation2]  }
   0x7   :  { %40 = dma.hbm_to_vmem [thread:$0]  %s33_s23, 128, %s35_s25, [#allocation6], %s487_s29, %s487_s29, %s488_s30  }
   0x8   :  { %s24_s8 = sshll.u32 %s489_s7, 4  ;;  %s47_s11 = sshll.u32 %s553_s3, 4  ;;  %s25_s8 = int_to_ptr.vmem [resolvable:$true] %s24_s8  ;;  %s48_s11 = int_to_ptr.hbm [resolvable:$true] %s47_s11 }
   0x9   :  { %27 = dma.hbm_to_vmem [thread:$0]  %s23_s28, 64, %s25_s8, [#allocation3]  }
   0xa   :  { %s60_s13 = sshll.u32 %s554_s4, 4  ;;  %s490_s14 = smov [#allocation7]   ;;  %s61_s13 = int_to_ptr.hbm [resolvable:$true] %s60_s13 }
   0xb   :  { %s49_s15 = sshll.u32 %s490_s14, 4  ;;  %s491_s0 = smov [#allocation8]   ;;  %s50_s15 = int_to_ptr.vmem [resolvable:$true] %s49_s15 }
   0xc   :  { %55 = dma.hbm_to_vmem [thread:$0]  %s48_s11, 256, %s50_s15, [#allocation6], %s487_s29, %s487_s29, %s488_s30  }
   0xd   :  { %s62_s16 = sshll.u32 %s491_s0, 4  ;;  %s63_s16 = int_to_ptr.vmem [resolvable:$true] %s62_s16 }
   0xe   :  { %68 = dma.hbm_to_vmem [thread:$0]  %s61_s13, 1024, %s63_s16, [#allocation9], %s487_s29, %s487_s29, %s488_s30  }
   0xf   :  { %476 = dma.done.wait [#allocation3], 64  }
  0x10   :  { %477 = vsyncadd [#allocation3], 4294967232 }
  0x11   :  { %478 = dma.done.wait [#allocation6], 384  }
  0x12   :  { %479 = vsyncadd [#allocation6], 4294966912 }
  0x13   :  { %480 = dma.done.wait [#allocation9], 1024  }
  0x14   :  { %481 = vsyncadd [#allocation9], 4294966272  ;;  %v312_v0 = vld [vmem:[#allocation5] sm:$0xff]  ;;  %v86_v1 = vld [vmem:[#allocation2] sm:$0xf]  ;;  %vm99_vm0 = vcmask 130048  }
  0x15   :  { %110 = vmatpush.bf16.msra.mxu0 %v312_v0  ;;  %v314_v2 = vld [vmem:[#allocation7 + $0x8] sm:$0xff]  ;;  %v313_v3 = vld [vmem:[#allocation7] sm:$0xff]  ;;  %v320_v6 = vld [vmem:[#allocation8 + $0x28] sm:$0xff]  ;;  %vm134_vm1 = vcmask 261120   ;;  %s492_s17 = smov [#allocation10]   ;;  %s238_s20 = sshll.u32 %s555_s5, 4  ;;  %s239_s20 = int_to_ptr.hbm [resolvable:$true] %s238_s20 }
  0x16   :  { %144 = vmatpush.bf16.msra.mxu1 %v314_v2  ;;  %v322_v4 = vld [vmem:[#allocation8 + $0x38] sm:$0xff]  ;;  %v321_v5 = vld [vmem:[#allocation8 + $0x30] sm:$0xff]  ;;  %v319_v7 = vld [vmem:[#allocation8 + $0x20] sm:$0xff]  ;;  %s236_s18 = sshll.u32 %s492_s17, 4  ;;  %s493_s21 = smov [#allocation11]   ;;  %s237_s18 = int_to_ptr.vmem [resolvable:$true] %s236_s18 }
  0x17   :  { %217 = vmatpush.bf16.msra.mxu2 %v322_v4  ;;  %v318_v8 = vld [vmem:[#allocation8 + $0x18] sm:$0xff]  ;;  %v317_v9 = vld [vmem:[#allocation8 + $0x10] sm:$0xff]  ;;  %v331_v10 = vld [vmem:[%s552_s2] ss:$0 sm:$0xff]  ;;  %s247_s22 = sshll.u32 %s493_s21, 4  ;;  %s249_s25 = sshll.u32 %s556_s6, 4  ;;  %s248_s22 = int_to_ptr.vmem [resolvable:$true] %s247_s22  ;;  %s250_s25 = int_to_ptr.hbm [resolvable:$true] %s249_s25 }
  0x18   :  { %270 = vmatmul.msk.bf16.vlgmr.msra.gmra.mxu0 %vm99_vm0, %v86_v1  ;;  %v316_v11 = vld [vmem:[#allocation8 + $0x8] sm:$0xff]  ;;  %v315_v17 = vld [vmem:[#allocation8] sm:$0xff] }
  0x1a   :  { %145 = vmatpush.bf16.msra.mxu1 %v313_v3 }
  0x1b   :  { %218 = vmatpush.bf16.msra.mxu2 %v321_v5 }
  0x1f   :  { %219 = vmatpush.bf16.msra.mxu2 %v320_v6 }
  0x23   :  { %220 = vmatpush.bf16.msra.mxu2 %v319_v7 }
  0x27   :  { %221 = vmatpush.bf16.msra.mxu2 %v318_v8 }
  0x2b   :  { %222 = vmatpush.bf16.msra.mxu2 %v317_v9 }
  0x2f   :  { %223 = vmatpush.bf16.msra.mxu2 %v316_v11 }
  0x33   :  { %224 = vmatpush.bf16.msra.mxu2 %v315_v17 }
  0x95   :  { %v112_v12 = vpop.f32.mrf.mxu0 }
  0x96   :  { %v113_v13 = vadd.f32 %v331_v10, %v112_v12 }
  0x98   :  { %v116_v14 = vmax.f32 %v113_v13, 0.0 }
  0x9a   :  { %v117_v15 = vpack.c.bf16 %v116_v14, %v116_v14 }
  0x9c   :  { %279 = vmatmul.msk.bf16.vlgmr.msra.gmra.mxu1 %vm134_vm1, %v117_v15 }
  0x9d   :  { %v114_v16 = vpop.f32.mrf.mxu0 }
 0x119   :  { %v147_v18 = vpop.f32.mrf.mxu1 }
 0x11a   :  { %v151_v19 = vpack.c.bf16 %v147_v18, %v147_v18 }
 0x11c   :  { %152 = vst [vmem:[#allocation10] sm:$0xf] %v151_v19  ;;  %225 = vmatmul.bf16.vlgmr.msra.gmra.mxu2 %v151_v19 }
 0x11d   :  { %241 = dma.vmem_to_hbm [thread:$0]  %s237_s18, 64, %s239_s20, [#allocation4]  }
 0x121   :  { %v149_v20 = vpop.f32.mrf.mxu1 }
 0x19f   :  { %v226_v21 = vpop.f32.mrf.mxu2 }
 0x1a0   :  { %230 = vst [vmem:[#allocation11] sm:$0xff] %v226_v21 }
 0x1a1   :  { %252 = dma.vmem_to_hbm [thread:$0]  %s248_s22, 128, %s250_s25, [#allocation12]  }
 0x1a7   :  { %v228_v22 = vpop.f32.mrf.mxu2 }
 0x1a8   :  { %482 = dma.done.wait [#allocation4], 64  }
 0x1a9   :  { %483 = vsyncadd [#allocation4], 4294967232 }
 0x1aa   :  { %484 = dma.done.wait [#allocation12], 128  }
 0x1ab   :  { %485 = vsyncadd [#allocation12], 4294967168 }
 0x1ac   :  { %261 = vsyncpa [#allocation3], 1 }
 0x1ad   :  { %262 = vsyncpa [#allocation6], 1 }
 0x1ae   :  { %263 = vsyncpa [#allocation9], 1 }
 0x1af   :  { %264 = vsyncpa [#allocation4], 1 }
 0x1b0   :  { %265 = vsyncpa [#allocation12], 1 }

</bundles_post_ra>
